<compile_context>
chip_gen: v7x
topology: tpu7x:2x2x1
jax: 0.10.0
libtpu: 0.0.40
codegen_flags: <defaults>
</compile_context>

<pallas_src>
import math

import jax
import jax.numpy as jnp
from jax.experimental import pallas as pl
from jax.experimental.pallas import tpu as pltpu


LANE = 128     # vreg lane width (last dim)
SUBLANE = 8    # vreg sublane width (second-to-last dim)


def _round_up(n, m):
    return ((n + m - 1) // m) * m


def _choose_tile(batch, tile_m):
    """Sublane-aligned batch tile with bounded pad waste (and v7x 2-core split)."""
    b8 = _round_up(max(batch, 1), SUBLANE)
    tm = min(_round_up(tile_m, SUBLANE), b8)
    # v7x megacore: for sizeable batches keep >= 2 grid steps so the "parallel"
    # batch axis can be sharded across both TensorCores.
    if b8 >= 256 and tm >= b8:
        tm = _round_up(-(-b8 // 2), SUBLANE)
    # Bound batch-padding waste at ~12.5% of the batch (avoid e.g. B=1200,
    # tm=1024 -> b_p=2048 doubling HBM traffic and MXU work on discarded rows).
    while tm > SUBLANE and (_round_up(b8, tm) - b8) * 8 > b8:
        tm = max(SUBLANE, _round_up(tm // 2, SUBLANE))
    return tm, _round_up(b8, tm)


def evolved_mlp_kernel(x_ref, w1_ref, b1_ref, w2_ref, b2_ref,
                       w3_ref, b3_ref, w4_ref, b4_ref, o_ref):
    f32 = jnp.float32
    x = x_ref[...]
    # fc1 + ReLU  (bias add / ReLU kept in f32: v5e has no bf16 VALU/EUP)
    h1 = jnp.dot(x, w1_ref[...], preferred_element_type=f32)
    h1 = jnp.maximum(h1 + b1_ref[...].astype(f32), 0.0)
    # fc2 + ReLU
    h2 = jnp.dot(h1.astype(w2_ref.dtype), w2_ref[...], preferred_element_type=f32)
    h2 = jnp.maximum(h2 + b2_ref[...].astype(f32), 0.0)
    # residual: fc3 input is (x2 + x); requires hidden_size[1] == input_size
    r = h2 + x.astype(f32)
    # fc3 -> Dropout -> ReLU.
    # TODO(synk): training-mode Dropout(p=0.3) mask not implemented; this is the
    # eval-mode forward (dropout == identity).
    h3 = jnp.dot(r.astype(w3_ref.dtype), w3_ref[...], preferred_element_type=f32)
    h3 = jnp.maximum(h3 + b3_ref[...].astype(f32), 0.0)
    # fc4 (no activation); extra output columns carry zero weights/bias.
    out = jnp.dot(h3.astype(w4_ref.dtype), w4_ref[...], preferred_element_type=f32)
    out = out + b4_ref[...].astype(f32)
    o_ref[...] = out.astype(o_ref.dtype)


def evolved_mlp_forward(x, params, *, tile_m=1024, compute_dtype=None,
                        single_buffer_weights=False):
    """x: (B, input_size). params: transposed weights (in,out) + (1,out) biases.

    compute_dtype: optionally jnp.bfloat16 for non-toy sizes (halves HBM traffic
    for the streamed x/out tiles and runs the MXU at its native bf16 rate;
    accumulation + elementwise math stay f32 in the kernel).
    """
    w1, b1 = params["w1"], params["b1"]
    w2, b2 = params["w2"], params["b2"]
    w3, b3 = params["w3"], params["b3"]
    w4, b4 = params["w4"], params["b4"]

    if compute_dtype is not None:
        cast = lambda a: a.astype(compute_dtype)
        x, w1, b1, w2, b2, w3, b3, w4, b4 = map(
            cast, (x, w1, b1, w2, b2, w3, b3, w4, b4))

    B, in_f = x.shape
    h0_f, h1_f, h2_f, out_f = w1.shape[1], w2.shape[1], w3.shape[1], w4.shape[1]
    # residual (x2 + x) in the original module requires this:
    assert in_f == h1_f, "EvolvedMLP residual needs hidden_size[1] == input_size"

    tm, b_p = _choose_tile(B, tile_m)
    out_p = _round_up(out_f, LANE)   # only the OUTPUT side is lane-padded

    # Batch pad only (no-op when B is already a tile multiple); padded rows are
    # sliced away below, so they are wasted work only, never a correctness bug.
    x_in = x if b_p == B else jnp.pad(x, ((0, b_p - B), (0, 0)))
    # Lane-pad w4/b4 with zeros so the output slab is 128-lane-dense (unmasked
    # vst); exact, since padded output columns are identically zero and sliced.
    if out_p != out_f:
        w4 = jnp.pad(w4, ((0, 0), (0, out_p - out_f)))
        b4 = jnp.pad(b4, ((0, 0), (0, out_p - out_f)))

    # Weights/biases: constant block index -> VMEM-resident across the grid.
    def resident(a):
        if single_buffer_weights:
            # Their block never changes, so double-buffering is pure VMEM waste;
            # single-buffer halves the resident footprint at large hidden dims.
            return pl.BlockSpec(a.shape, lambda i: (0, 0),
                                pipeline_mode=pl.Buffered(1))
        return pl.BlockSpec(a.shape, lambda i: (0, 0))

    itemsize = x.dtype.itemsize
    weight_elems = sum(int(a.size) for a in (w1, b1, w2, b2, w3, b3, w4, b4))

    # Advisory cost for XLA's scheduler (overlap with surrounding HLO).
    flops = 2 * b_p * (in_f * h0_f + h0_f * h1_f + h1_f * h2_f + h2_f * out_f)
    bytes_accessed = itemsize * (b_p * in_f + b_p * out_p + weight_elems)
    cost = pl.CostEstimate(flops=int(flops), transcendentals=0,
                           bytes_accessed=int(bytes_accessed))

    # VMEM budget: resident weights (2x if default double-buffered) +
    # double-buffered streamed x/out tiles + intermediate activations.
    weight_bufs = 1 if single_buffer_weights else 2
    est_vmem = itemsize * (weight_bufs * weight_elems
                           + 2 * tm * (in_f + out_p)
                           + tm * (h0_f + h1_f + h2_f))
    vmem_limit = None
    if est_vmem > (16 << 20):   # v5e default scoped-VMEM limit
        vmem_limit = min(int(est_vmem * 1.25) + (1 << 20), 64 << 20)  # v7x cap

    grid = (b_p // tm,)
    out_padded = pl.pallas_call(
        evolved_mlp_kernel,
        out_shape=jax.ShapeDtypeStruct((b_p, out_p), x.dtype),
        grid=grid,
        in_specs=[
            pl.BlockSpec((tm, in_f), lambda i: (i, 0)),   # streamed, unpadded x
            resident(w1), resident(b1),
            resident(w2), resident(b2),
            resident(w3), resident(b3),
            resident(w4), resident(b4),
        ],
        out_specs=pl.BlockSpec((tm, out_p), lambda i: (i, 0)),
        compiler_params=pltpu.CompilerParams(
            dimension_semantics=("parallel",),   # shard batch tiles across TCs
            vmem_limit_bytes=vmem_limit,
        ),
        cost_estimate=cost,
    )(x_in, w1, b1, w2, b2, w3, b3, w4, b4)

    return out_padded[:B, :out_f]


# ---------------------------------------------------------------------------
# Parameter init matching the PyTorch module (kaiming_uniform_ weights,
# default nn.Linear bias init), stored transposed for the kernel.
# ---------------------------------------------------------------------------
def kaiming_uniform(key, fan_in, shape):
    gain = math.sqrt(2.0)
    bound = gain * math.sqrt(3.0 / fan_in)
    return jax.random.uniform(key, shape, jnp.float32, minval=-bound, maxval=bound)


def linear_bias_init(key, fan_in, out_features):
    bound = 1.0 / math.sqrt(fan_in)
    return jax.random.uniform(key, (1, out_features), jnp.float32,
                              minval=-bound, maxval=bound)


def init_params(key, input_size, hidden_size, output_size):
    h0, h1, h2 = hidden_size
    ks = jax.random.split(key, 8)
    w1 = kaiming_uniform(ks[0], input_size, (h0, input_size)).T
    b1 = linear_bias_init(ks[1], input_size, h0)
    w2 = kaiming_uniform(ks[2], h0, (h1, h0)).T
    b2 = linear_bias_init(ks[3], h0, h1)
    w3 = kaiming_uniform(ks[4], h1, (h2, h1)).T
    b3 = linear_bias_init(ks[5], h1, h2)
    w4 = kaiming_uniform(ks[6], h2, (output_size, h2)).T
    b4 = linear_bias_init(ks[7], h2, output_size)
    return {"w1": w1, "b1": b1, "w2": w2, "b2": b2,
            "w3": w3, "b3": b3, "w4": w4, "b4": b4}


def evolved_mlp_reference(x, p):
    h1 = jnp.maximum(x @ p["w1"] + p["b1"], 0.0)
    h2 = jnp.maximum(h1 @ p["w2"] + p["b2"], 0.0)
    r = h2 + x
    h3 = jnp.maximum(r @ p["w3"] + p["b3"], 0.0)   # dropout is identity in eval
    return h3 @ p["w4"] + p["b4"]


if __name__ == "__main__":
    input_size = 32
    hidden_size = (64, 32, 48)   # hidden_size[1] must equal input_size (residual)
    output_size = 16
    batch = 8

    key = jax.random.PRNGKey(0)
    k_x, k_p = jax.random.split(key)

    x = jax.random.normal(k_x, (batch, input_size), jnp.float32)
    params = init_params(k_p, input_size, hidden_size, output_size)

    out = evolved_mlp_forward(x, params)
    out = jax.block_until_ready(out)

    ref = evolved_mlp_reference(x, params)
    assert out.shape == (batch, output_size), out.shape
    assert jnp.allclose(out, ref, atol=1e-4, rtol=1e-4), "mismatch vs reference"

    print("KERNEL_OK")
</pallas_src>

<mosaic_0001>
module attributes {stable_mosaic.version = 11 : i64} {
  func.func @evolved_mlp_kernel(%arg0: i32, %arg1: memref<8x32xf32, #tpu.memory_space<vmem>>, %arg2: memref<32x64xf32, #tpu.memory_space<vmem>>, %arg3: memref<1x64xf32, #tpu.memory_space<vmem>>, %arg4: memref<64x32xf32, #tpu.memory_space<vmem>>, %arg5: memref<1x32xf32, #tpu.memory_space<vmem>>, %arg6: memref<32x48xf32, #tpu.memory_space<vmem>>, %arg7: memref<1x48xf32, #tpu.memory_space<vmem>>, %arg8: memref<48x128xf32, #tpu.memory_space<vmem>>, %arg9: memref<1x128xf32, #tpu.memory_space<vmem>>, %arg10: memref<8x128xf32, #tpu.memory_space<vmem>>) attributes {dimension_semantics = [#tpu.dimension_semantics<parallel>], iteration_bounds = array<i64: 1>, scalar_prefetch = 0 : i64, scratch_operands = 0 : i64, tpu.core_type = #tpu.core_type<tc>, window_params = [{transform_indices = @transform_0, window_bounds = array<i64: 8, 32>}, {pipeline_mode = #tpu.pipeline_mode<synchronous>, transform_indices = @transform_1, window_bounds = array<i64: 32, 64>}, {pipeline_mode = #tpu.pipeline_mode<synchronous>, transform_indices = @transform_2, window_bounds = array<i64: 1, 64>}, {pipeline_mode = #tpu.pipeline_mode<synchronous>, transform_indices = @transform_3, window_bounds = array<i64: 64, 32>}, {pipeline_mode = #tpu.pipeline_mode<synchronous>, transform_indices = @transform_4, window_bounds = array<i64: 1, 32>}, {pipeline_mode = #tpu.pipeline_mode<synchronous>, transform_indices = @transform_5, window_bounds = array<i64: 32, 48>}, {pipeline_mode = #tpu.pipeline_mode<synchronous>, transform_indices = @transform_6, window_bounds = array<i64: 1, 48>}, {pipeline_mode = #tpu.pipeline_mode<synchronous>, transform_indices = @transform_7, window_bounds = array<i64: 48, 128>}, {pipeline_mode = #tpu.pipeline_mode<synchronous>, transform_indices = @transform_8, window_bounds = array<i64: 1, 128>}, {transform_indices = @transform_9, window_bounds = array<i64: 8, 128>}]} {
    %c0 = arith.constant 0 : index
    %c0_0 = arith.constant 0 : index
    %0 = vector.load %arg1[%c0, %c0_0] : memref<8x32xf32, #tpu.memory_space<vmem>>, vector<8x32xf32>
    %c0_1 = arith.constant 0 : index
    %c0_2 = arith.constant 0 : index
    %1 = vector.load %arg2[%c0_1, %c0_2] : memref<32x64xf32, #tpu.memory_space<vmem>>, vector<32x64xf32>
    %cst = arith.constant dense<0.000000e+00> : vector<8x64xf32>
    %2 = tpu.matmul %0, %1, %cst {dimension_numbers = #tpu.dot_dimension_numbers<[1], [0], [0], [1], [0, 0, 1, 1], [], []>} : vector<8x32xf32>, vector<32x64xf32>, vector<8x64xf32> -> vector<8x64xf32>
    %c0_3 = arith.constant 0 : index
    %c0_4 = arith.constant 0 : index
    %3 = vector.load %arg3[%c0_3, %c0_4] : memref<1x64xf32, #tpu.memory_space<vmem>>, vector<1x64xf32>
    %4 = vector.broadcast %3 : vector<1x64xf32> to vector<8x64xf32>
    %5 = arith.addf %2, %4 : vector<8x64xf32>
    %cst_5 = arith.constant 0.000000e+00 : f32
    %6 = vector.broadcast %cst_5 : f32 to vector<8x64xf32>
    %7 = arith.maximumf %5, %6 : vector<8x64xf32>
    %c0_6 = arith.constant 0 : index
    %c0_7 = arith.constant 0 : index
    %8 = vector.load %arg4[%c0_6, %c0_7] : memref<64x32xf32, #tpu.memory_space<vmem>>, vector<64x32xf32>
    %cst_8 = arith.constant dense<0.000000e+00> : vector<8x32xf32>
    %9 = tpu.matmul %7, %8, %cst_8 {dimension_numbers = #tpu.dot_dimension_numbers<[1], [0], [0], [1], [0, 0, 1, 1], [], []>} : vector<8x64xf32>, vector<64x32xf32>, vector<8x32xf32> -> vector<8x32xf32>
    %c0_9 = arith.constant 0 : index
    %c0_10 = arith.constant 0 : index
    %10 = vector.load %arg5[%c0_9, %c0_10] : memref<1x32xf32, #tpu.memory_space<vmem>>, vector<1x32xf32>
    %11 = vector.broadcast %10 : vector<1x32xf32> to vector<8x32xf32>
    %12 = arith.addf %9, %11 : vector<8x32xf32>
    %cst_11 = arith.constant 0.000000e+00 : f32
    %13 = vector.broadcast %cst_11 : f32 to vector<8x32xf32>
    %14 = arith.maximumf %12, %13 : vector<8x32xf32>
    %15 = arith.addf %14, %0 : vector<8x32xf32>
    %c0_12 = arith.constant 0 : index
    %c0_13 = arith.constant 0 : index
    %16 = vector.load %arg6[%c0_12, %c0_13] : memref<32x48xf32, #tpu.memory_space<vmem>>, vector<32x48xf32>
    %cst_14 = arith.constant dense<0.000000e+00> : vector<8x48xf32>
    %17 = tpu.matmul %15, %16, %cst_14 {dimension_numbers = #tpu.dot_dimension_numbers<[1], [0], [0], [1], [0, 0, 1, 1], [], []>} : vector<8x32xf32>, vector<32x48xf32>, vector<8x48xf32> -> vector<8x48xf32>
    %c0_15 = arith.constant 0 : index
    %c0_16 = arith.constant 0 : index
    %18 = vector.load %arg7[%c0_15, %c0_16] : memref<1x48xf32, #tpu.memory_space<vmem>>, vector<1x48xf32>
    %19 = vector.broadcast %18 : vector<1x48xf32> to vector<8x48xf32>
    %20 = arith.addf %17, %19 : vector<8x48xf32>
    %cst_17 = arith.constant 0.000000e+00 : f32
    %21 = vector.broadcast %cst_17 : f32 to vector<8x48xf32>
    %22 = arith.maximumf %20, %21 : vector<8x48xf32>
    %c0_18 = arith.constant 0 : index
    %c0_19 = arith.constant 0 : index
    %23 = vector.load %arg8[%c0_18, %c0_19] : memref<48x128xf32, #tpu.memory_space<vmem>>, vector<48x128xf32>
    %cst_20 = arith.constant dense<0.000000e+00> : vector<8x128xf32>
    %24 = tpu.matmul %22, %23, %cst_20 {dimension_numbers = #tpu.dot_dimension_numbers<[1], [0], [0], [1], [0, 0, 1, 1], [], []>} : vector<8x48xf32>, vector<48x128xf32>, vector<8x128xf32> -> vector<8x128xf32>
    %c0_21 = arith.constant 0 : index
    %c0_22 = arith.constant 0 : index
    %25 = vector.load %arg9[%c0_21, %c0_22] : memref<1x128xf32, #tpu.memory_space<vmem>>, vector<1x128xf32>
    %26 = vector.broadcast %25 : vector<1x128xf32> to vector<8x128xf32>
    %27 = arith.addf %24, %26 : vector<8x128xf32>
    %c0_23 = arith.constant 0 : index
    %c0_24 = arith.constant 0 : index
    %28 = vector.load %arg10[%c0_23, %c0_24] : memref<8x128xf32, #tpu.memory_space<vmem>>, vector<8x128xf32>
    tpu.vector_store %arg10[%c0_23, %c0_24], %27 {strides = array<i32>} : memref<8x128xf32, #tpu.memory_space<vmem>>, vector<8x128xf32>,
    return
  }
  func.func @transform_0(%arg0: i32) -> (i32, i32) {
    %c0_i32 = arith.constant 0 : i32
    %c0_i32_0 = arith.constant 0 : i32
    return %arg0, %c0_i32 : i32, i32
  }
  func.func @transform_1(%arg0: i32) -> (i32, i32) {
    %c0_i32 = arith.constant 0 : i32
    %c0_i32_0 = arith.constant 0 : i32
    %c0_i32_1 = arith.constant 0 : i32
    return %c0_i32, %c0_i32_0 : i32, i32
  }
  func.func @transform_2(%arg0: i32) -> (i32, i32) {
    %c0_i32 = arith.constant 0 : i32
    %c0_i32_0 = arith.constant 0 : i32
    %c0_i32_1 = arith.constant 0 : i32
    return %c0_i32, %c0_i32_0 : i32, i32
  }
  func.func @transform_3(%arg0: i32) -> (i32, i32) {
    %c0_i32 = arith.constant 0 : i32
    %c0_i32_0 = arith.constant 0 : i32
    %c0_i32_1 = arith.constant 0 : i32
    return %c0_i32, %c0_i32_0 : i32, i32
  }
  func.func @transform_4(%arg0: i32) -> (i32, i32) {
    %c0_i32 = arith.constant 0 : i32
    %c0_i32_0 = arith.constant 0 : i32
    %c0_i32_1 = arith.constant 0 : i32
    return %c0_i32, %c0_i32_0 : i32, i32
  }
  func.func @transform_5(%arg0: i32) -> (i32, i32) {
    %c0_i32 = arith.constant 0 : i32
    %c0_i32_0 = arith.constant 0 : i32
    %c0_i32_1 = arith.constant 0 : i32
    return %c0_i32, %c0_i32_0 : i32, i32
  }
  func.func @transform_6(%arg0: i32) -> (i32, i32) {
    %c0_i32 = arith.constant 0 : i32
    %c0_i32_0 = arith.constant 0 : i32
    %c0_i32_1 = arith.constant 0 : i32
    return %c0_i32, %c0_i32_0 : i32, i32
  }
  func.func @transform_7(%arg0: i32) -> (i32, i32) {
    %c0_i32 = arith.constant 0 : i32
    %c0_i32_0 = arith.constant 0 : i32
    %c0_i32_1 = arith.constant 0 : i32
    return %c0_i32, %c0_i32_0 : i32, i32
  }
  func.func @transform_8(%arg0: i32) -> (i32, i32) {
    %c0_i32 = arith.constant 0 : i32
    %c0_i32_0 = arith.constant 0 : i32
    %c0_i32_1 = arith.constant 0 : i32
    return %c0_i32, %c0_i32_0 : i32, i32
  }
  func.func @transform_9(%arg0: i32) -> (i32, i32) {
    %c0_i32 = arith.constant 0 : i32
    %c0_i32_0 = arith.constant 0 : i32
    return %arg0, %c0_i32 : i32, i32
  }
}

</mosaic_0001>

<bundles_post_ra>
// kernel: tpu_custom_call.1
= control target key start
LH: loop header
LB: loop body
LE: loop exit
PB: predicated region body
PF: predicated region fallthrough
CT: control target
= control target key end

     0   :  { %14 = vsyncpa [#allocation3], 0  ;;  %s765_s0 = inlined_call_operand.hbm [shape: f32[8,32], index: 0, kind: input, shape index: {}]   ;;  %s766_s1 = inlined_call_operand.vmem [shape: f32[32,64], index: 1, kind: input, shape index: {}]   ;;  %s767_s2 = inlined_call_operand.vmem [shape: f32[1,64], index: 2, kind: input, shape index: {}]   ;;  %s768_s3 = inlined_call_operand.vmem [shape: f32[64,32], index: 3, kind: input, shape index: {}]   ;;  %s769_s4 = inlined_call_operand.vmem [shape: f32[1,32], index: 4, kind: input, shape index: {}]   ;;  %s770_s5 = inlined_call_operand.vmem [shape: f32[32,48], index: 5, kind: input, shape index: {}]   ;;  %s771_s6 = inlined_call_operand.vmem [shape: f32[1,48], index: 6, kind: input, shape index: {}]   ;;  %s772_s7 = inlined_call_operand.vmem [shape: f32[48,128], index: 7, kind: input, shape index: {}]   ;;  %s773_s8 = inlined_call_operand.vmem [shape: f32[1,128], index: 8, kind: input, shape index: {}]   ;;  %s774_s9 = inlined_call_operand.hbm [shape: f32[8,128], index: 9, kind: output, shape index: {}]  }
   0x1   :  { %15 = vsyncpa [#allocation4], 0  ;;  %s587_s30 = smov [#allocation2]   ;;  %s539_s13 = scalar_lea.hbm %s765_s0, 128 }
   0x2   :  { %s22_s10 = sshll.u32 %s587_s30, 4  ;;  %p540_p0 = scmp.ne.s32.totalorder %s765_s0, %s539_s13  ;;  %s23_s10 = int_to_ptr.vmem [resolvable:$true] %s22_s10 }
   0x3   :  { %p543_p1 = scmp.lt.u32.totalorder %s539_s13, %s765_s0 }
   0x5   :  { %p545_p2 = pnand %p543_p1, %p540_p0 }
   0x7   :  { %548 = shalt.err (!%p545_p2)
}
   0x8   :  { %s549_s18 = scalar_lea.vmem %s23_s10, 128  ;;  %p554_p4 = scmp.lt.s32.totalorder %s23_s10, %s23_s10 }
   0x9   :  { %p550_p3 = scmp.ne.s32.totalorder %s23_s10, %s549_s18  ;;  %p555_p5 = scmp.lt.s32.totalorder %s549_s18, %s549_s18 }
   0xb   :  { %p556_p6 = por %p555_p5, %p554_p4 }
   0xd   :  { %p557_p7 = pnand %p556_p6, %p550_p3 }
   0xf   :  { %560 = shalt.err (!%p557_p7)
}
  0x10   :  { %25 = dma.hbm_to_vmem [thread:$0]  %s765_s0, 128, %s23_s10, [#allocation3]  }
  0x11   :  { %583 = dma.done.wait [#allocation3], 128  }
  0x12   :  { %584 = vsyncadd [#allocation3], 4294967168  ;;  %v588_v0 = vmov 0.0|0.0   ;;  %vm589_vm0 = vmmov 0   ;;  %v590_v1 = vmov 0.0   ;;  %v46_v2 = vld [vmem:[%s766_s1] sm:$0xff] }
  0x13   :  { %501 = vmatprep.subr.bf16.mxu1 %v588_v0  ;;  %453 = vmatprep.mubr.msk.f32.mxu1 %vm589_vm0, %v590_v1  ;;  %v47_v3 = vld [vmem:[%s766_s1 + $0x8] sm:$0xff]  ;;  %v48_v4 = vld [vmem:[%s766_s1 + $0x10] sm:$0xff]  ;;  %v49_v6 = vld [vmem:[%s766_s1 + $0x18] sm:$0xff]  ;;  %vm57_vm1 = vcmask 261120   ;;  %vm147_vm2 = vcmask 523264   ;;  %vm321_vm3 = vcmask 392192  }
  0x14   :  { %519 = vmatprep.subr.bf16.mxu0 %v588_v0  ;;  %483 = vmatprep.mubr.msk.f32.mxu0 %vm589_vm0, %v590_v1  ;;  %v502_v5 = vpack.c.bf16 %v47_v3, %v46_v2  ;;  %v505_v7 = vpack.c.bf16 %v49_v6, %v48_v4  ;;  %v132_v8 = vld [vmem:[%s768_s3] sm:$0xff]  ;;  %v133_v9 = vld [vmem:[%s768_s3 + $0x8] sm:$0xff]  ;;  %v134_v12 = vld [vmem:[%s768_s3 + $0x10] sm:$0xff]  ;;  %s591_s0 = smov [#allocation5]  }
  0x15   :  { %v45_v10 = vld [vmem:[#allocation2] sm:$0xff]  ;;  %v508_v11 = vpack.c.bf16 %v133_v9, %v132_v8  ;;  %v135_v13 = vld [vmem:[%s768_s3 + $0x18] sm:$0xff]  ;;  %v137_v16 = vld [vmem:[%s768_s3 + $0x28] sm:$0xff]  ;;  %s402_s23 = sshll.u32 %s591_s0, 4  ;;  %s403_s23 = int_to_ptr.vmem [resolvable:$true] %s402_s23 }
  0x16   :  { %503 = vmatpush3.bf16.msra.mxu1 %v502_v5  ;;  %v511_v14 = vpack.c.bf16 %v135_v13, %v134_v12  ;;  %v136_v15 = vld [vmem:[%s768_s3 + $0x20] sm:$0xff]  ;;  %v138_v18 = vld [vmem:[%s768_s3 + $0x30] sm:$0xff]  ;;  %v139_v19 = vld [vmem:[%s768_s3 + $0x38] sm:$0xff]  ;;  %p566_p9 = scmp.lt.s32.totalorder %s403_s23, %s403_s23 }
  0x17   :  { %504 = vmatprep.subr.bf16.mxu1 %v588_v0  ;;  %v514_v17 = vpack.c.bf16 %v137_v16, %v136_v15  ;;  %v517_v20 = vpack.c.bf16 %v139_v19, %v138_v18  ;;  %v411_v21 = vld [vmem:[%s767_s2] ss:$0 sm:$0xff]  ;;  %v224_v27 = vld [vmem:[%s770_s5 + $0x8] sm:$0xff]  ;;  %v225_v29 = vld [vmem:[%s770_s5 + $0x10] sm:$0xff] }
  0x18   :  { %v223_v26 = vld [vmem:[%s770_s5] sm:$0xff]  ;;  %v226_v30 = vld [vmem:[%s770_s5 + $0x18] sm:$0xff]  ;;  %v309_v37 = vld [vmem:[%s772_s7 + $0x8] sm:$0xff] }
  0x19   :  { %v520_v28 = vpack.c.bf16 %v224_v27, %v223_v26  ;;  %v523_v31 = vpack.c.bf16 %v226_v30, %v225_v29  ;;  %v413_v32 = vld [vmem:[%s769_s4] ss:$0 sm:$0xff]  ;;  %v310_v41 = vld [vmem:[%s772_s7 + $0x10] sm:$0xff]  ;;  %v311_v42 = vld [vmem:[%s772_s7 + $0x18] sm:$0xff] }
  0x1a   :  { %506 = vmatpush3.bf16.msra.mxu1 %v505_v7  ;;  %v308_v36 = vld [vmem:[%s772_s7] sm:$0xff]  ;;  %v529_v43 = vpack.c.bf16 %v311_v42, %v310_v41  ;;  %v313_v45 = vld [vmem:[%s772_s7 + $0x28] sm:$0xff] }
  0x1b   :  { %507 = vmatprep.subr.bf16.mxu1 %v588_v0  ;;  %521 = vmatpush3.bf16.msra.mxu0 %v520_v28  ;;  %v526_v39 = vpack.c.bf16 %v309_v37, %v308_v36  ;;  %v312_v44 = vld [vmem:[%s772_s7 + $0x20] sm:$0xff]  ;;  %s561_s7 = scalar_lea.vmem %s403_s23, 128 }
  0x1c   :  { %522 = vmatprep.subr.bf16.mxu0 %v588_v0  ;;  %v532_v46 = vpack.c.bf16 %v313_v45, %v312_v44  ;;  %v415_v47 = vld [vmem:[%s771_s6] ss:$0 sm:$0xff]  ;;  %p562_p8 = scmp.ne.s32.totalorder %s403_s23, %s561_s7  ;;  %p567_p10 = scmp.lt.s32.totalorder %s561_s7, %s561_s7 }
  0x1d   :  { %454 = vmatmul.mubr.msk.f32.vlgmr.msra.gmra.mrb[0].mxu1 %vm57_vm1, %v45_v10  ;;  %v417_v52 = vld [vmem:[%s773_s8] ss:$0 sm:$0xff] }
  0x1e   :  { %509 = vmatpush3.bf16.msra.mxu1 %v508_v11  ;;  %472 = vmatprep.mubr.msk.f32.mxu1 %vm589_vm0, %v590_v1  ;;  %p568_p11 = por %p567_p10, %p566_p9 }
  0x1f   :  { %510 = vmatprep.subr.bf16.mxu1 %v588_v0  ;;  %524 = vmatpush3.bf16.msra.mxu0 %v523_v31 }
  0x20   :  { %525 = vmatprep.subr.bf16.mxu0 %v588_v0  ;;  %p569_p12 = pnand %p568_p11, %p562_p8 }
  0x22   :  { %512 = vmatpush3.bf16.msra.mxu1 %v511_v14 }
  0x23   :  { %513 = vmatprep.subr.bf16.mxu1 %v588_v0 }
  0x26   :  { %515 = vmatpush3.bf16.msra.mxu1 %v514_v17 }
  0x27   :  { %516 = vmatprep.subr.bf16.mxu1 %v588_v0 }
  0x2a   :  { %518 = vmatpush3.bf16.msra.mxu1 %v517_v20 }
  0xf0   :  { %v127_v22 = vpop.f32.mrb[0].mxu1 }
  0xf1   :  { %v128_v23 = vadd.f32 %v411_v21, %v127_v22  ;;  %v455_v24 = vpop.f32.mrb[1].mxu1 }
  0xf3   :  { %v131_v25 = vmax.f32 %v128_v23, 0.0 }
  0xf5   :  { %473 = vmatmul.mubr.msk.f32.vlgmr.msra.gmra.mrb[2].mxu1 %vm147_vm2, %v131_v25 }
 0x1c8   :  { %v217_v33 = vpop.f32.mrb[2].mxu1 }
 0x1c9   :  { %v218_v34 = vadd.f32 %v413_v32, %v217_v33  ;;  %v474_v35 = vpop.f32.mrb[3].mxu1 }
 0x1cb   :  { %v221_v38 = vmax.f32 %v218_v34, 0.0 }
 0x1cd   :  { %v222_v40 = vadd.f32 %v221_v38, %v45_v10 }
 0x1cf   :  { %484 = vmatmul.mubr.msk.f32.vlgmr.msra.gmra.mrb[0].mxu0 %vm57_vm1, %v222_v40 }
 0x1d0   :  { %527 = vmatpush3.bf16.msra.mxu0 %v526_v39  ;;  %498 = vmatprep.mubr.msk.f32.mxu0 %vm589_vm0, %v590_v1 }
 0x1d1   :  { %528 = vmatprep.subr.bf16.mxu0 %v588_v0 }
 0x1d4   :  { %530 = vmatpush3.bf16.msra.mxu0 %v529_v43 }
 0x1d5   :  { %531 = vmatprep.subr.bf16.mxu0 %v588_v0 }
 0x1d8   :  { %533 = vmatpush3.bf16.msra.mxu0 %v532_v46 }
 0x2a2   :  { %v303_v48 = vpop.f32.mrb[0].mxu0 }
 0x2a3   :  { %v304_v49 = vadd.f32 %v415_v47, %v303_v48  ;;  %v485_v50 = vpop.f32.mrb[1].mxu0 }
 0x2a5   :  { %v307_v51 = vmax.f32 %v304_v49, 0.0 }
 0x2a7   :  { %499 = vmatmul.mubr.msk.f32.vlgmr.msra.gmra.mrb[2].mxu0 %vm321_vm3, %v307_v51 }
 0x37a   :  { %v391_v53 = vpop.f32.mrb[2].mxu0 }
 0x37b   :  { %v392_v54 = vadd.f32 %v417_v52, %v391_v53  ;;  %v500_v55 = vpop.f32.mrb[3].mxu0 }
 0x37d   :  { %395 = vst [vmem:[#allocation5] sm:$0xff] %v392_v54 }
 0x37e   :  { %572 = shalt.err (!%p569_p12)
}
 0x37f   :  { %s573_s25 = scalar_lea.hbm %s774_s9, 128 }
 0x380   :  { %p574_p13 = scmp.ne.s32.totalorder %s774_s9, %s573_s25  ;;  %p577_p0 = scmp.lt.u32.totalorder %s573_s25, %s774_s9 }
 0x382   :  { %p579_p1 = pnand %p577_p0, %p574_p13 }
 0x384   :  { %582 = shalt.err (!%p579_p1)
}
 0x385   :  { %405 = dma.vmem_to_hbm [thread:$0]  %s403_s23, 128, %s774_s9, [#allocation4]  }
 0x386   :  { %585 = dma.done.wait [#allocation4], 128  }
 0x387   :  { %586 = vsyncadd [#allocation4], 4294967168 }
 0x388   :  { %409 = vsyncpa [#allocation3], 1 }
 0x389   :  { %410 = vsyncpa [#allocation4], 1 }

</bundles_post_ra>
